<compile_context>
chip_gen: v7x
topology: tpu7x:2x2x1
jax: 0.10.0
libtpu: 0.0.40
codegen_flags: <defaults>
</compile_context>

<pallas_src>
import functools

import jax
import jax.numpy as jnp
from jax.experimental import pallas as pl
from jax.experimental.pallas import tpu as pltpu


def _round_up(x, m):
    return ((x + m - 1) // m) * m


def _vmem_budget():
    """Generation-aware scoped-VMEM budget / limit (bytes)."""
    try:
        cap = int(pltpu.get_tpu_info().vmem_capacity_bytes)
    except Exception:
        cap = 64 * 1024 * 1024                    # conservative: v7x per-TC VMEM
    budget = min(96 * 1024 * 1024, (3 * cap) // 4)  # 96 MiB on v5e/v6e, 48 MiB on v7x
    limit = min((7 * cap) // 8, budget + 16 * 1024 * 1024)
    return budget, limit


def _pick_bm(rows_padded, in_cols, out_cols, budget):
    """Largest 128-multiple divisor of rows_padded whose double-buffered tiles fit."""
    fits = []
    for bm in range(128, rows_padded + 1, 128):
        if rows_padded % bm:
            continue
        need = (8 * bm * (in_cols + out_cols)     # double-buffered input + output slab
                + 16 * bm * bm                    # in-kernel eye tile / iota temps
                + 8 * (bm + out_cols))            # d_row / d_col (tiny)
        if need <= budget:
            fits.append(bm)
    if not fits:
        # TODO(synk): for very large N (>~20k) add a column grid dimension instead of
        # full-width row slabs; irrelevant at MOFGCN sizes (N ~ 1.2k).
        return 128
    if rows_padded >= 256:
        multi = [bm for bm in fits if rows_padded // bm >= 2]
        if multi:                                  # >= 2 row blocks: v7x dual-TC split
            return max(multi)
    return max(fits)


def _cell_rows_kernel(a_ref, drow_ref, dcol_ref, out_ref, *, bm, cpc, n_cell):
    # a_ref:    (bm, dpc)       zero-padded A row slab
    # drow_ref: (bm, 1)         d for these (cell) rows
    # dcol_ref: (1, dpc)        d for the drug columns
    # out_ref:  (bm, cpc + dpc) output row slab
    i = pl.program_id(0)
    drow = drow_ref[...]                                           # (bm, 1)
    # Drug-column block: d_cell[i] * A[i, k] * d_drug[k]  (aligned, lane-dense).
    out_ref[:, cpc:] = (drow * a_ref[...] * dcol_ref[...]).astype(out_ref.dtype)
    # Cell-column block: zeros + one aligned (bm, bm) diagonal tile.
    out_ref[:, :cpc] = jnp.zeros((bm, cpc), out_ref.dtype)
    r = jax.lax.broadcasted_iota(jnp.int32, (bm, bm), 0)
    c = jax.lax.broadcasted_iota(jnp.int32, (bm, bm), 1)
    valid = (i * bm + r) < n_cell                  # padded rows stay exactly zero
    eye = jnp.where((r == c) & valid, 1.0 + drow * drow, 0.0).astype(out_ref.dtype)
    for k in range(cpc // bm):                     # static offsets; one branch runs
        @pl.when(i == k)
        def _():
            out_ref[:, k * bm:(k + 1) * bm] = eye


def _drug_rows_kernel(at_ref, drow_ref, dcol_ref, out_ref, *, bm, cpc, n_drug):
    # at_ref:   (bm, cpc)       zero-padded A^T row slab
    # drow_ref: (bm, 1)         d for these (drug) rows
    # dcol_ref: (1, cpc)        d for the cell columns
    # out_ref:  (bm, cpc + dpc) output row slab
    j = pl.program_id(0)
    dpc = out_ref.shape[1] - cpc
    drow = drow_ref[...]                                           # (bm, 1)
    # Cell-column block: d_drug[k] * A^T[k, i] * d_cell[i]  (aligned, lane-dense).
    out_ref[:, :cpc] = (drow * at_ref[...] * dcol_ref[...]).astype(out_ref.dtype)
    # Drug-column block: zeros + one aligned (bm, bm) diagonal tile.
    out_ref[:, cpc:] = jnp.zeros((bm, dpc), out_ref.dtype)
    r = jax.lax.broadcasted_iota(jnp.int32, (bm, bm), 0)
    c = jax.lax.broadcasted_iota(jnp.int32, (bm, bm), 1)
    valid = (j * bm + r) < n_drug                  # padded rows stay exactly zero
    eye = jnp.where((r == c) & valid, 1.0 + drow * drow, 0.0).astype(out_ref.dtype)
    for k in range(dpc // bm):
        @pl.when(j == k)
        def _():
            out_ref[:, cpc + k * bm:cpc + (k + 1) * bm] = eye


@jax.jit
def construct_adj_matrix_hat(adj_mat):
    """Exact equivalent of ConstructAdjMatrix.forward(): (N, N) float32."""
    A = adj_mat.astype(jnp.float32)
    n_cell, n_drug = A.shape
    cpc = _round_up(n_cell, 128)          # cell-column region (128-lane granular)
    dpc = _round_up(n_drug, 128)          # drug-column region
    mp = cpc + dpc

    # d = rsqrt(rowsum(S)) computed analytically from A (padded entries -> 0).
    d_cell = jax.lax.rsqrt(1.0 + jnp.sum(A, axis=1))
    d_drug = jax.lax.rsqrt(1.0 + jnp.sum(A, axis=0))
    d_cell_p = jnp.zeros((cpc,), jnp.float32).at[:n_cell].set(d_cell)
    d_drug_p = jnp.zeros((dpc,), jnp.float32).at[:n_drug].set(d_drug)

    a_pad = jnp.zeros((cpc, dpc), jnp.float32).at[:n_cell, :n_drug].set(A)
    at_pad = jnp.zeros((dpc, cpc), jnp.float32).at[:n_drug, :n_cell].set(A.T)

    budget, vmem_limit = _vmem_budget()
    cparams = pltpu.CompilerParams(dimension_semantics=("parallel",),
                                   vmem_limit_bytes=vmem_limit)

    # ---- cell-row slabs -----------------------------------------------------
    bm_c = _pick_bm(cpc, dpc, mp, budget)
    hat_cell = pl.pallas_call(
        functools.partial(_cell_rows_kernel, bm=bm_c, cpc=cpc, n_cell=n_cell),
        out_shape=jax.ShapeDtypeStruct((cpc, mp), jnp.float32),
        grid=(cpc // bm_c,),
        in_specs=[
            pl.BlockSpec((bm_c, dpc), lambda i: (i, 0)),
            pl.BlockSpec((bm_c, 1), lambda i: (i, 0)),
            pl.BlockSpec((1, dpc), lambda i: (0, 0)),
        ],
        out_specs=pl.BlockSpec((bm_c, mp), lambda i: (i, 0)),
        compiler_params=cparams,
        cost_estimate=pl.CostEstimate(
            flops=3 * cpc * dpc, transcendentals=0,
            bytes_accessed=4 * (cpc * dpc + cpc + dpc + cpc * mp)),
    )(a_pad, d_cell_p.reshape(cpc, 1), d_drug_p.reshape(1, dpc))

    # ---- drug-row slabs -----------------------------------------------------
    bm_d = _pick_bm(dpc, cpc, mp, budget)
    hat_drug = pl.pallas_call(
        functools.partial(_drug_rows_kernel, bm=bm_d, cpc=cpc, n_drug=n_drug),
        out_shape=jax.ShapeDtypeStruct((dpc, mp), jnp.float32),
        grid=(dpc // bm_d,),
        in_specs=[
            pl.BlockSpec((bm_d, cpc), lambda i: (i, 0)),
            pl.BlockSpec((bm_d, 1), lambda i: (i, 0)),
            pl.BlockSpec((1, cpc), lambda i: (0, 0)),
        ],
        out_specs=pl.BlockSpec((bm_d, mp), lambda i: (i, 0)),
        compiler_params=cparams,
        cost_estimate=pl.CostEstimate(
            flops=3 * cpc * dpc, transcendentals=0,
            bytes_accessed=4 * (cpc * dpc + cpc + dpc + dpc * mp)),
    )(at_pad, d_drug_p.reshape(dpc, 1), d_cell_p.reshape(1, cpc))

    # ---- exact (N, N) assembly ----------------------------------------------
    # Padded rows/cols of hat_cell / hat_drug are exactly zero, so a downstream
    # GCN with a zero-padded feature matrix could consume them directly with no
    # copy at all.  For the module's exact semantics, assemble (N, N) with a
    # single output-buffer write (4 in-place update slices) instead of the
    # previous two full concatenates.
    N = n_cell + n_drug
    hat = jnp.zeros((N, N), jnp.float32)
    hat = hat.at[:n_cell, :n_cell].set(hat_cell[:n_cell, :n_cell])
    hat = hat.at[:n_cell, n_cell:].set(hat_cell[:n_cell, cpc:cpc + n_drug])
    hat = hat.at[n_cell:, :n_cell].set(hat_drug[:n_drug, :n_cell])
    hat = hat.at[n_cell:, n_cell:].set(hat_drug[:n_drug, cpc:cpc + n_drug])
    return hat


def _reference(adj_mat):
    adj_mat = adj_mat.astype(jnp.float32)
    n_cell, n_drug = adj_mat.shape
    top = jnp.concatenate([jnp.eye(n_cell, dtype=jnp.float32), adj_mat], axis=1)
    bot = jnp.concatenate([adj_mat.T, jnp.eye(n_drug, dtype=jnp.float32)], axis=1)
    s = jnp.concatenate([top, bot], axis=0)
    d = jnp.power(jnp.sum(s, axis=1), -0.5)
    dm = jnp.diag(d)
    return jnp.eye(s.shape[0], dtype=jnp.float32) + dm @ (s @ dm)


if __name__ == "__main__":
    key = jax.random.PRNGKey(0)
    k1, k2 = jax.random.split(key)
    # Small deterministic examples; the second exercises multiple row blocks
    # and the padded-row/column gating.
    for (n_cell, n_drug), k in (((40, 24), k1), ((200, 72), k2)):
        adj_mat = (jax.random.uniform(k, (n_cell, n_drug)) < 0.3).astype(jnp.float32)
        out = jax.block_until_ready(construct_adj_matrix_hat(adj_mat))
        ref = _reference(adj_mat)
        assert out.shape == (n_cell + n_drug, n_cell + n_drug)
        assert jnp.allclose(out, ref, atol=1e-5, rtol=1e-5)
    print("KERNEL_OK")
</pallas_src>

<mosaic_0001>
module attributes {stable_mosaic.version = 11 : i64} {
  func.func @_cell_rows_kernel(%arg0: i32, %arg1: memref<128x128xf32, #tpu.memory_space<vmem>>, %arg2: memref<128x1xf32, #tpu.memory_space<vmem>>, %arg3: memref<1x128xf32, #tpu.memory_space<vmem>>, %arg4: memref<128x256xf32, #tpu.memory_space<vmem>>) attributes {dimension_semantics = [#tpu.dimension_semantics<parallel>], iteration_bounds = array<i64: 1>, scalar_prefetch = 0 : i64, scratch_operands = 0 : i64, tpu.core_type = #tpu.core_type<tc>, window_params = [{transform_indices = @transform_0, window_bounds = array<i64: 128, 128>}, {transform_indices = @transform_1, window_bounds = array<i64: 128, 1>}, {pipeline_mode = #tpu.pipeline_mode<synchronous>, transform_indices = @transform_2, window_bounds = array<i64: 1, 128>}, {transform_indices = @transform_3, window_bounds = array<i64: 128, 256>}]} {
    %c0 = arith.constant 0 : index
    %c0_0 = arith.constant 0 : index
    %0 = vector.load %arg2[%c0, %c0_0] : memref<128x1xf32, #tpu.memory_space<vmem>>, vector<128x1xf32>
    %c0_1 = arith.constant 0 : index
    %c0_2 = arith.constant 0 : index
    %1 = vector.load %arg1[%c0_1, %c0_2] : memref<128x128xf32, #tpu.memory_space<vmem>>, vector<128x128xf32>
    %2 = vector.broadcast %0 : vector<128x1xf32> to vector<128x128xf32>
    %3 = arith.mulf %2, %1 : vector<128x128xf32>
    %c0_3 = arith.constant 0 : index
    %c0_4 = arith.constant 0 : index
    %4 = vector.load %arg3[%c0_3, %c0_4] : memref<1x128xf32, #tpu.memory_space<vmem>>, vector<1x128xf32>
    %5 = vector.broadcast %4 : vector<1x128xf32> to vector<128x128xf32>
    %6 = arith.mulf %3, %5 : vector<128x128xf32>
    %c0_5 = arith.constant 0 : index
    %c128 = arith.constant 128 : index
    %7 = vector.load %arg4[%c0_5, %c128] : memref<128x256xf32, #tpu.memory_space<vmem>>, vector<128x128xf32>
    tpu.vector_store %arg4[%c0_5, %c128], %6 {strides = array<i32>} : memref<128x256xf32, #tpu.memory_space<vmem>>, vector<128x128xf32>,
    %cst = arith.constant 0.000000e+00 : f32
    %8 = vector.broadcast %cst : f32 to vector<128x128xf32>
    %c0_6 = arith.constant 0 : index
    %c0_7 = arith.constant 0 : index
    %9 = vector.load %arg4[%c0_6, %c0_7] : memref<128x256xf32, #tpu.memory_space<vmem>>, vector<128x128xf32>
    tpu.vector_store %arg4[%c0_6, %c0_7], %8 {strides = array<i32>} : memref<128x256xf32, #tpu.memory_space<vmem>>, vector<128x128xf32>,
    %10 = tpu.iota {dimensions = array<i32: 0>} : vector<128x128xi32>
    %11 = tpu.iota {dimensions = array<i32: 1>} : vector<128x128xi32>
    %c128_i32 = arith.constant 128 : i32
    %12 = arith.muli %arg0, %c128_i32 : i32
    %13 = vector.broadcast %12 : i32 to vector<128x128xi32>
    %14 = arith.addi %13, %10 : vector<128x128xi32>
    %c40_i32 = arith.constant 40 : i32
    %15 = vector.broadcast %c40_i32 : i32 to vector<128x128xi32>
    %16 = arith.cmpi slt, %14, %15 : vector<128x128xi32>
    %17 = arith.cmpi eq, %10, %11 : vector<128x128xi32>
    %18 = arith.andi %17, %16 : vector<128x128xi1>
    %19 = arith.mulf %0, %0 : vector<128x1xf32>
    %cst_8 = arith.constant 1.000000e+00 : f32
    %20 = vector.broadcast %cst_8 : f32 to vector<128x1xf32>
    %21 = arith.addf %20, %19 : vector<128x1xf32>
    %cst_9 = arith.constant 0.000000e+00 : f32
    %22 = vector.shape_cast %21 : vector<128x1xf32> to vector<128x1xf32>
    %23 = vector.broadcast %22 : vector<128x1xf32> to vector<128x128xf32>
    %24 = vector.broadcast %cst_9 : f32 to vector<128x128xf32>
    %25 = arith.select %18, %23, %24 : vector<128x128xi1>, vector<128x128xf32>
    %c0_i32 = arith.constant 0 : i32
    %26 = arith.cmpi eq, %arg0, %c0_i32 : i32
    %27 = arith.extui %26 : i1 to i32
    %c0_i32_10 = arith.constant 0 : i32
    %28 = arith.cmpi ne, %27, %c0_i32_10 : i32
    scf.if %28 {
      %c0_11 = arith.constant 0 : index
      %c0_12 = arith.constant 0 : index
      %29 = vector.load %arg4[%c0_11, %c0_12] : memref<128x256xf32, #tpu.memory_space<vmem>>, vector<128x128xf32>
      tpu.vector_store %arg4[%c0_11, %c0_12], %25 {strides = array<i32>} : memref<128x256xf32, #tpu.memory_space<vmem>>, vector<128x128xf32>,
    } else {
    }
    return
  }
  func.func @transform_0(%arg0: i32) -> (i32, i32) {
    %c0_i32 = arith.constant 0 : i32
    %c0_i32_0 = arith.constant 0 : i32
    return %arg0, %c0_i32 : i32, i32
  }
  func.func @transform_1(%arg0: i32) -> (i32, i32) {
    %c0_i32 = arith.constant 0 : i32
    %c0_i32_0 = arith.constant 0 : i32
    return %arg0, %c0_i32 : i32, i32
  }
  func.func @transform_2(%arg0: i32) -> (i32, i32) {
    %c0_i32 = arith.constant 0 : i32
    %c0_i32_0 = arith.constant 0 : i32
    %c0_i32_1 = arith.constant 0 : i32
    return %c0_i32, %c0_i32_0 : i32, i32
  }
  func.func @transform_3(%arg0: i32) -> (i32, i32) {
    %c0_i32 = arith.constant 0 : i32
    %c0_i32_0 = arith.constant 0 : i32
    return %arg0, %c0_i32 : i32, i32
  }
}

module attributes {stable_mosaic.version = 11 : i64} {
  func.func @_drug_rows_kernel(%arg0: i32, %arg1: memref<128x128xf32, #tpu.memory_space<vmem>>, %arg2: memref<128x1xf32, #tpu.memory_space<vmem>>, %arg3: memref<1x128xf32, #tpu.memory_space<vmem>>, %arg4: memref<128x256xf32, #tpu.memory_space<vmem>>) attributes {dimension_semantics = [#tpu.dimension_semantics<parallel>], iteration_bounds = array<i64: 1>, scalar_prefetch = 0 : i64, scratch_operands = 0 : i64, tpu.core_type = #tpu.core_type<tc>, window_params = [{transform_indices = @transform_0, window_bounds = array<i64: 128, 128>}, {transform_indices = @transform_1, window_bounds = array<i64: 128, 1>}, {pipeline_mode = #tpu.pipeline_mode<synchronous>, transform_indices = @transform_2, window_bounds = array<i64: 1, 128>}, {transform_indices = @transform_3, window_bounds = array<i64: 128, 256>}]} {
    %c0 = arith.constant 0 : index
    %c0_0 = arith.constant 0 : index
    %0 = vector.load %arg2[%c0, %c0_0] : memref<128x1xf32, #tpu.memory_space<vmem>>, vector<128x1xf32>
    %c0_1 = arith.constant 0 : index
    %c0_2 = arith.constant 0 : index
    %1 = vector.load %arg1[%c0_1, %c0_2] : memref<128x128xf32, #tpu.memory_space<vmem>>, vector<128x128xf32>
    %2 = vector.broadcast %0 : vector<128x1xf32> to vector<128x128xf32>
    %3 = arith.mulf %2, %1 : vector<128x128xf32>
    %c0_3 = arith.constant 0 : index
    %c0_4 = arith.constant 0 : index
    %4 = vector.load %arg3[%c0_3, %c0_4] : memref<1x128xf32, #tpu.memory_space<vmem>>, vector<1x128xf32>
    %5 = vector.broadcast %4 : vector<1x128xf32> to vector<128x128xf32>
    %6 = arith.mulf %3, %5 : vector<128x128xf32>
    %c0_5 = arith.constant 0 : index
    %c0_6 = arith.constant 0 : index
    %7 = vector.load %arg4[%c0_5, %c0_6] : memref<128x256xf32, #tpu.memory_space<vmem>>, vector<128x128xf32>
    tpu.vector_store %arg4[%c0_5, %c0_6], %6 {strides = array<i32>} : memref<128x256xf32, #tpu.memory_space<vmem>>, vector<128x128xf32>,
    %cst = arith.constant 0.000000e+00 : f32
    %8 = vector.broadcast %cst : f32 to vector<128x128xf32>
    %c0_7 = arith.constant 0 : index
    %c128 = arith.constant 128 : index
    %9 = vector.load %arg4[%c0_7, %c128] : memref<128x256xf32, #tpu.memory_space<vmem>>, vector<128x128xf32>
    tpu.vector_store %arg4[%c0_7, %c128], %8 {strides = array<i32>} : memref<128x256xf32, #tpu.memory_space<vmem>>, vector<128x128xf32>,
    %10 = tpu.iota {dimensions = array<i32: 0>} : vector<128x128xi32>
    %11 = tpu.iota {dimensions = array<i32: 1>} : vector<128x128xi32>
    %c128_i32 = arith.constant 128 : i32
    %12 = arith.muli %arg0, %c128_i32 : i32
    %13 = vector.broadcast %12 : i32 to vector<128x128xi32>
    %14 = arith.addi %13, %10 : vector<128x128xi32>
    %c24_i32 = arith.constant 24 : i32
    %15 = vector.broadcast %c24_i32 : i32 to vector<128x128xi32>
    %16 = arith.cmpi slt, %14, %15 : vector<128x128xi32>
    %17 = arith.cmpi eq, %10, %11 : vector<128x128xi32>
    %18 = arith.andi %17, %16 : vector<128x128xi1>
    %19 = arith.mulf %0, %0 : vector<128x1xf32>
    %cst_8 = arith.constant 1.000000e+00 : f32
    %20 = vector.broadcast %cst_8 : f32 to vector<128x1xf32>
    %21 = arith.addf %20, %19 : vector<128x1xf32>
    %cst_9 = arith.constant 0.000000e+00 : f32
    %22 = vector.shape_cast %21 : vector<128x1xf32> to vector<128x1xf32>
    %23 = vector.broadcast %22 : vector<128x1xf32> to vector<128x128xf32>
    %24 = vector.broadcast %cst_9 : f32 to vector<128x128xf32>
    %25 = arith.select %18, %23, %24 : vector<128x128xi1>, vector<128x128xf32>
    %c0_i32 = arith.constant 0 : i32
    %26 = arith.cmpi eq, %arg0, %c0_i32 : i32
    %27 = arith.extui %26 : i1 to i32
    %c0_i32_10 = arith.constant 0 : i32
    %28 = arith.cmpi ne, %27, %c0_i32_10 : i32
    scf.if %28 {
      %c0_11 = arith.constant 0 : index
      %c128_12 = arith.constant 128 : index
      %29 = vector.load %arg4[%c0_11, %c128_12] : memref<128x256xf32, #tpu.memory_space<vmem>>, vector<128x128xf32>
      tpu.vector_store %arg4[%c0_11, %c128_12], %25 {strides = array<i32>} : memref<128x256xf32, #tpu.memory_space<vmem>>, vector<128x128xf32>,
    } else {
    }
    return
  }
  func.func @transform_0(%arg0: i32) -> (i32, i32) {
    %c0_i32 = arith.constant 0 : i32
    %c0_i32_0 = arith.constant 0 : i32
    return %arg0, %c0_i32 : i32, i32
  }
  func.func @transform_1(%arg0: i32) -> (i32, i32) {
    %c0_i32 = arith.constant 0 : i32
    %c0_i32_0 = arith.constant 0 : i32
    return %arg0, %c0_i32 : i32, i32
  }
  func.func @transform_2(%arg0: i32) -> (i32, i32) {
    %c0_i32 = arith.constant 0 : i32
    %c0_i32_0 = arith.constant 0 : i32
    %c0_i32_1 = arith.constant 0 : i32
    return %c0_i32, %c0_i32_0 : i32, i32
  }
  func.func @transform_3(%arg0: i32) -> (i32, i32) {
    %c0_i32 = arith.constant 0 : i32
    %c0_i32_0 = arith.constant 0 : i32
    return %arg0, %c0_i32 : i32, i32
  }
}

</mosaic_0001>

<bundles_post_ra>
// kernel: construct_adj_matrix_hat.2
= control target key start
LH: loop header
LB: loop body
LE: loop exit
PB: predicated region body
PF: predicated region fallthrough
CT: control target
= control target key end

     0   :  { %v439_v0 = vmov 0   ;;  %v440_v26 = vmov 0.0   ;;  %s674_s1 = inlined_call_operand.vmem [shape: f32[128,1], index: 1, kind: input, shape index: {}]   ;;  %s675_s3 = inlined_call_operand.vmem [shape: f32[128,256], index: 3, kind: output, shape index: {}]   ;;  %s676_s0 = inlined_call_operand.vmem [shape: f32[128,128], index: 0, kind: input, shape index: {}]   ;;  %s677_s2 = inlined_call_operand.vmem [shape: f32[1,128], index: 2, kind: input, shape index: {}]  }
   0x1   :  { %438 = vset.pattern.permute.xlu1 %v439_v0  ;;  %437 = vset.pattern.permute.xlu0 %v439_v0  ;;  %v16_v1 = vld [vmem:[%s674_s1 + $0x10] sm:$0xff]  ;;  %v14_v2 = vld [vmem:[%s674_s1] sm:$0xff]  ;;  %v17_v3 = vld [vmem:[%s674_s1 + $0x18] sm:$0xff]  ;;  %419 = vst [vmem:[%s675_s3 + $0x50] sm:$0xff] %v440_v26 }
   0x2   :  { %58 = vperm.xlu1 %438, %v16_v1   ;;  %48 = vperm.xlu0 %437, %v14_v2   ;;  %v15_v4 = vld [vmem:[%s674_s1 + $0x8] sm:$0xff]  ;;  %v18_v6 = vld [vmem:[%s674_s1 + $0x20] sm:$0xff]  ;;  %v21_v7 = vld [vmem:[%s674_s1 + $0x38] sm:$0xff]  ;;  %v282_v15 = vmul.f32 %v14_v2, %v14_v2  ;;  %v284_v19 = vmul.f32 %v16_v1, %v16_v1  ;;  %v285_v21 = vmul.f32 %v17_v3, %v17_v3 }
   0x3   :  { %v19_v5 = vld [vmem:[%s674_s1 + $0x28] sm:$0xff]  ;;  %v20_v8 = vld [vmem:[%s674_s1 + $0x30] sm:$0xff]  ;;  %v22_v10 = vld [vmem:[%s674_s1 + $0x40] sm:$0xff]  ;;  %v283_v16 = vmul.f32 %v15_v4, %v15_v4  ;;  %v286_v25 = vmul.f32 %v18_v6, %v18_v6  ;;  %420 = vst [vmem:[%s675_s3 + $0x60] sm:$0xff] %v440_v26 }
   0x4   :  { %v23_v9 = vld [vmem:[%s674_s1 + $0x48] sm:$0xff]  ;;  %v25_v11 = vld [vmem:[%s674_s1 + $0x58] sm:$0xff]  ;;  %v24_v12 = vld [vmem:[%s674_s1 + $0x50] sm:$0xff]  ;;  %v298_v20 = vadd.f32 1.0, %v282_v15  ;;  %v300_v23 = vadd.f32 1.0, %v284_v19  ;;  %v301_v24 = vadd.f32 1.0, %v285_v21 }
   0x5   :  { %v27_v13 = vld [vmem:[%s674_s1 + $0x68] sm:$0xff]  ;;  %v26_v14 = vld [vmem:[%s674_s1 + $0x60] sm:$0xff]  ;;  %v29_v17 = vld [vmem:[%s674_s1 + $0x78] sm:$0xff]  ;;  %v299_v22 = vadd.f32 1.0, %v283_v16  ;;  %421 = vst [vmem:[%s675_s3 + $0x70] sm:$0xff] %v440_v26  ;;  %v302_v27 = vadd.f32 1.0, %v286_v25 }
   0x6   :  { %63 = vperm.xlu1 %438, %v17_v3   ;;  %53 = vperm.xlu0 %437, %v15_v4   ;;  %v28_v18 = vld [vmem:[%s674_s1 + $0x70] sm:$0xff]  ;;  %422 = vst [vmem:[%s675_s3 + $0x80] sm:$0xff] %v440_v26  ;;  %423 = vst [vmem:[%s675_s3 + $0x90] sm:$0xff] %v440_v26  ;;  %v30_v29 = vld [vmem:[%s676_s0] sm:$0xff] }
   0x7   :  { %424 = vst [vmem:[%s675_s3 + $0xa0] sm:$0xff] %v440_v26  ;;  %425 = vst [vmem:[%s675_s3 + $0xb0] sm:$0xff] %v440_v26  ;;  %v32_v28 = vld [vmem:[%s676_s0 + $0x10] sm:$0xff]  ;;  %v551_v30 = vld [vmem:[%s677_s2] ss:$0 sm:$0xff] }
   0x8   :  { %426 = vst [vmem:[%s675_s3 + $0xc0] sm:$0xff] %v440_v26  ;;  %427 = vst [vmem:[%s675_s3 + $0xd0] sm:$0xff] %v440_v26  ;;  %v33_v35 = vld [vmem:[%s676_s0 + $0x18] sm:$0xff]  ;;  %v31_v36 = vld [vmem:[%s676_s0 + $0x8] sm:$0xff] }
   0x9   :  { %428 = vst [vmem:[%s675_s3 + $0xe0] sm:$0xff] %v440_v26  ;;  %429 = vst [vmem:[%s675_s3 + $0xf0] sm:$0xff] %v440_v26  ;;  %v35_v43 = vld [vmem:[%s676_s0 + $0x28] sm:$0xff]  ;;  %v34_v44 = vld [vmem:[%s676_s0 + $0x20] sm:$0xff] }
   0xa   :  { %73 = vperm.xlu1 %438, %v19_v5   ;;  %68 = vperm.xlu0 %437, %v18_v6   ;;  %v37_v51 = vld [vmem:[%s676_s0 + $0x38] sm:$0xff]  ;;  %v36_v52 = vld [vmem:[%s676_s0 + $0x30] sm:$0xff]  ;;  %v39_v59 = vld [vmem:[%s676_s0 + $0x48] sm:$0xff]  ;;  %v197_v5 = vlaneseq }
   0xb   :  { %v38_v60 = vld [vmem:[%s676_s0 + $0x40] sm:$0xff]  ;;  %v41_v3 = vld [vmem:[%s676_s0 + $0x58] sm:$0xff]  ;;  %v40_v4 = vld [vmem:[%s676_s0 + $0x50] sm:$0xff] }
   0xc   :  { %v45_v21 = vld [vmem:[%s676_s0 + $0x78] sm:$0xff] }
   0xe   :  { %83 = vperm.xlu1 %438, %v21_v7   ;;  %78 = vperm.xlu0 %437, %v20_v8  }
  0x12   :  { %93 = vperm.xlu1 %438, %v23_v9   ;;  %88 = vperm.xlu0 %437, %v22_v10  }
  0x16   :  { %103 = vperm.xlu1 %438, %v25_v11   ;;  %98 = vperm.xlu0 %437, %v24_v12   ;;  %v43_v12 = vld [vmem:[%s676_s0 + $0x68] sm:$0xff] }
  0x1a   :  { %113 = vperm.xlu1 %438, %v27_v13   ;;  %108 = vperm.xlu0 %437, %v26_v14   ;;  %v42_v13 = vld [vmem:[%s676_s0 + $0x60] sm:$0xff]  ;;  %v198_v14 = vshrl.u32 %v197_v5, 7 }
  0x1e   :  { %123 = vperm.xlu1 %438, %v29_v17   ;;  %118 = vperm.xlu0 %437, %v28_v18  }
  0x22   :  { %321 = vperm.xlu1 %438, %v299_v22   ;;  %316 = vperm.xlu0 %437, %v298_v20   ;;  %v44_v22 = vld [vmem:[%s676_s0 + $0x70] sm:$0xff] }
  0x26   :  { %331 = vperm.xlu1 %438, %v301_v24   ;;  %326 = vperm.xlu0 %437, %v300_v23   ;;  %v199_v23 = vadd.s32 8, %v198_v14  ;;  %v215_v24 = vand.u32 127, %v197_v5 }
  0x28   :  { %vm251_vm0 = vcmp.eq.s32.totalorder %v199_v23, %v215_v24  ;;  %vm250_vm1 = vcmp.eq.s32.totalorder %v198_v14, %v215_v24 }
  0x2a   :  { %336 = vperm.xlu0 %437, %v302_v27  }
  0x81   :  { %v59_v31 = vpop.permute.xlu1 %58  ;;  %v49_v32 = vpop.permute.xlu0 %48 }
  0x82   :  { %v128_v33 = vmul.f32 %v59_v31, %v32_v28  ;;  %v126_v34 = vmul.f32 %v49_v32, %v30_v29  ;;  %v201_v32 = vadd.s32 24, %v198_v14 }
  0x84   :  { %v151_v37 = vmul.f32 %v551_v30, %v128_v33  ;;  %v149_v38 = vmul.f32 %v551_v30, %v126_v34  ;;  %v200_v33 = vadd.s32 16, %v198_v14  ;;  %vm253_vm2 = vcmp.eq.s32.totalorder %v201_v32, %v215_v24 }
  0x85   :  { %v64_v39 = vpop.permute.xlu1 %63  ;;  %v54_v40 = vpop.permute.xlu0 %53 }
  0x86   :  { %167 = vst [vmem:[%s675_s3 + $0x28] sm:$0xff] %v151_v37  ;;  %165 = vst [vmem:[%s675_s3 + $0x8] sm:$0xff] %v149_v38  ;;  %v129_v41 = vmul.f32 %v64_v39, %v33_v35  ;;  %v127_v42 = vmul.f32 %v54_v40, %v31_v36  ;;  %vm252_vm3 = vcmp.eq.s32.totalorder %v200_v33, %v215_v24 }
  0x88   :  { %v152_v45 = vmul.f32 %v551_v30, %v129_v41  ;;  %v150_v46 = vmul.f32 %v551_v30, %v127_v42 }
  0x89   :  { %v74_v47 = vpop.permute.xlu1 %73  ;;  %v69_v48 = vpop.permute.xlu0 %68 }
  0x8a   :  { %168 = vst [vmem:[%s675_s3 + $0x38] sm:$0xff] %v152_v45  ;;  %166 = vst [vmem:[%s675_s3 + $0x18] sm:$0xff] %v150_v46  ;;  %v131_v49 = vmul.f32 %v74_v47, %v35_v43  ;;  %v130_v50 = vmul.f32 %v69_v48, %v34_v44 }
  0x8c   :  { %v154_v53 = vmul.f32 %v551_v30, %v131_v49  ;;  %v153_v54 = vmul.f32 %v551_v30, %v130_v50 }
  0x8d   :  { %v84_v55 = vpop.permute.xlu1 %83  ;;  %v79_v56 = vpop.permute.xlu0 %78 }
  0x8e   :  { %170 = vst [vmem:[%s675_s3 + $0x58] sm:$0xff] %v154_v53  ;;  %169 = vst [vmem:[%s675_s3 + $0x48] sm:$0xff] %v153_v54  ;;  %v133_v57 = vmul.f32 %v84_v55, %v37_v51  ;;  %v132_v58 = vmul.f32 %v79_v56, %v36_v52 }
  0x90   :  { %v156_v61 = vmul.f32 %v551_v30, %v133_v57  ;;  %v155_v62 = vmul.f32 %v551_v30, %v132_v58 }
  0x91   :  { %v94_v63 = vpop.permute.xlu1 %93  ;;  %v89_v0 = vpop.permute.xlu0 %88 }
  0x92   :  { %172 = vst [vmem:[%s675_s3 + $0x78] sm:$0xff] %v156_v61  ;;  %171 = vst [vmem:[%s675_s3 + $0x68] sm:$0xff] %v155_v62  ;;  %v135_v1 = vmul.f32 %v94_v63, %v39_v59  ;;  %v134_v2 = vmul.f32 %v89_v0, %v38_v60 }
  0x94   :  { %v158_v6 = vmul.f32 %v551_v30, %v135_v1  ;;  %v157_v7 = vmul.f32 %v551_v30, %v134_v2 }
  0x95   :  { %v104_v8 = vpop.permute.xlu1 %103  ;;  %v99_v9 = vpop.permute.xlu0 %98 }
  0x96   :  { %174 = vst [vmem:[%s675_s3 + $0x98] sm:$0xff] %v158_v6  ;;  %173 = vst [vmem:[%s675_s3 + $0x88] sm:$0xff] %v157_v7  ;;  %v137_v10 = vmul.f32 %v104_v8, %v41_v3  ;;  %v136_v11 = vmul.f32 %v99_v9, %v40_v4 }
  0x98   :  { %v160_v15 = vmul.f32 %v551_v30, %v137_v10  ;;  %v159_v16 = vmul.f32 %v551_v30, %v136_v11 }
  0x99   :  { %v114_v17 = vpop.permute.xlu1 %113  ;;  %v109_v18 = vpop.permute.xlu0 %108 }
  0x9a   :  { %176 = vst [vmem:[%s675_s3 + $0xb8] sm:$0xff] %v160_v15  ;;  %175 = vst [vmem:[%s675_s3 + $0xa8] sm:$0xff] %v159_v16  ;;  %v139_v19 = vmul.f32 %v114_v17, %v43_v12  ;;  %v138_v20 = vmul.f32 %v109_v18, %v42_v13 }
  0x9c   :  { %v162_v25 = vmul.f32 %v551_v30, %v139_v19  ;;  %v161_v26 = vmul.f32 %v551_v30, %v138_v20 }
  0x9d   :  { %v124_v27 = vpop.permute.xlu1 %123  ;;  %v119_v28 = vpop.permute.xlu0 %118 }
  0x9e   :  { %178 = vst [vmem:[%s675_s3 + $0xd8] sm:$0xff] %v162_v25  ;;  %177 = vst [vmem:[%s675_s3 + $0xc8] sm:$0xff] %v161_v26  ;;  %v141_v29 = vmul.f32 %v124_v27, %v45_v21  ;;  %v140_v31 = vmul.f32 %v119_v28, %v44_v22 }
  0xa0   :  { %v164_v34 = vmul.f32 %v551_v30, %v141_v29  ;;  %v163_v35 = vmul.f32 %v551_v30, %v140_v31  ;;  %v202_v30 = vadd.s32 32, %v198_v14 }
  0xa1   :  { %v322_v36 = vpop.permute.xlu1 %321  ;;  %v317_v37 = vpop.permute.xlu0 %316 }
  0xa2   :  { %180 = vst [vmem:[%s675_s3 + $0xf8] sm:$0xff] %v164_v34  ;;  %179 = vst [vmem:[%s675_s3 + $0xe8] sm:$0xff] %v163_v35  ;;  %v395_v38 = vsel %vm251_vm0, %v322_v36, 0.0  ;;  %v394_v39 = vsel %vm250_vm1, %v317_v37, 0.0  ;;  %vm254_vm4 = vcmp.eq.s32.totalorder %v202_v30, %v215_v24 }
  0xa3   :  { %415 = vst [vmem:[%s675_s3 + $0x10] sm:$0xff] %v395_v38  ;;  %414 = vst [vmem:[%s675_s3] sm:$0xff] %v394_v39 }
  0xa5   :  { %v332_v40 = vpop.permute.xlu1 %331  ;;  %v327_v41 = vpop.permute.xlu0 %326 }
  0xa6   :  { %v397_v42 = vsel %vm253_vm2, %v332_v40, 0.0  ;;  %v396_v43 = vsel %vm252_vm3, %v327_v41, 0.0 }
  0xa7   :  { %417 = vst [vmem:[%s675_s3 + $0x30] sm:$0xff] %v397_v42  ;;  %416 = vst [vmem:[%s675_s3 + $0x20] sm:$0xff] %v396_v43 }
  0xa9   :  { %v337_v44 = vpop.permute.xlu0 %336 }
  0xaa   :  { %v398_v45 = vsel %vm254_vm4, %v337_v44, 0.0 }
  0xab   :  { %418 = vst [vmem:[%s675_s3 + $0x40] sm:$0xff] %v398_v45 }

// kernel: construct_adj_matrix_hat.3
= control target key start
LH: loop header
LB: loop body
LE: loop exit
PB: predicated region body
PF: predicated region fallthrough
CT: control target
= control target key end

     0   :  { %v439_v0 = vmov 0   ;;  %v440_v23 = vmov 0.0   ;;  %s674_s1 = inlined_call_operand.vmem [shape: f32[128,1], index: 1, kind: input, shape index: {}]   ;;  %s675_s3 = inlined_call_operand.vmem [shape: f32[128,256], index: 3, kind: output, shape index: {}]   ;;  %s676_s0 = inlined_call_operand.vmem [shape: f32[128,128], index: 0, kind: input, shape index: {}]   ;;  %s677_s2 = inlined_call_operand.vmem [shape: f32[1,128], index: 2, kind: input, shape index: {}]  }
   0x1   :  { %438 = vset.pattern.permute.xlu1 %v439_v0  ;;  %437 = vset.pattern.permute.xlu0 %v439_v0  ;;  %v16_v1 = vld [vmem:[%s674_s1 + $0x10] sm:$0xff]  ;;  %v14_v2 = vld [vmem:[%s674_s1] sm:$0xff]  ;;  %v17_v3 = vld [vmem:[%s674_s1 + $0x18] sm:$0xff]  ;;  %417 = vst [vmem:[%s675_s3 + $0x38] sm:$0xff] %v440_v23 }
   0x2   :  { %58 = vperm.xlu1 %438, %v16_v1   ;;  %48 = vperm.xlu0 %437, %v14_v2   ;;  %v15_v4 = vld [vmem:[%s674_s1 + $0x8] sm:$0xff]  ;;  %v18_v6 = vld [vmem:[%s674_s1 + $0x20] sm:$0xff]  ;;  %v21_v7 = vld [vmem:[%s674_s1 + $0x38] sm:$0xff]  ;;  %v282_v15 = vmul.f32 %v14_v2, %v14_v2  ;;  %v284_v19 = vmul.f32 %v16_v1, %v16_v1  ;;  %418 = vst [vmem:[%s675_s3 + $0x48] sm:$0xff] %v440_v23  ;;  %v197_v1 = vlaneseq }
   0x3   :  { %v19_v5 = vld [vmem:[%s674_s1 + $0x28] sm:$0xff]  ;;  %v20_v8 = vld [vmem:[%s674_s1 + $0x30] sm:$0xff]  ;;  %v22_v10 = vld [vmem:[%s674_s1 + $0x40] sm:$0xff]  ;;  %v283_v16 = vmul.f32 %v15_v4, %v15_v4  ;;  %419 = vst [vmem:[%s675_s3 + $0x58] sm:$0xff] %v440_v23 }
   0x4   :  { %v23_v9 = vld [vmem:[%s674_s1 + $0x48] sm:$0xff]  ;;  %v25_v11 = vld [vmem:[%s674_s1 + $0x58] sm:$0xff]  ;;  %v24_v12 = vld [vmem:[%s674_s1 + $0x50] sm:$0xff]  ;;  %v298_v20 = vadd.f32 1.0, %v282_v15  ;;  %v300_v22 = vadd.f32 1.0, %v284_v19  ;;  %420 = vst [vmem:[%s675_s3 + $0x68] sm:$0xff] %v440_v23 }
   0x5   :  { %v27_v13 = vld [vmem:[%s674_s1 + $0x68] sm:$0xff]  ;;  %v26_v14 = vld [vmem:[%s674_s1 + $0x60] sm:$0xff]  ;;  %v29_v17 = vld [vmem:[%s674_s1 + $0x78] sm:$0xff]  ;;  %v299_v21 = vadd.f32 1.0, %v283_v16  ;;  %421 = vst [vmem:[%s675_s3 + $0x78] sm:$0xff] %v440_v23 }
   0x6   :  { %63 = vperm.xlu1 %438, %v17_v3   ;;  %53 = vperm.xlu0 %437, %v15_v4   ;;  %v28_v18 = vld [vmem:[%s674_s1 + $0x70] sm:$0xff]  ;;  %422 = vst [vmem:[%s675_s3 + $0x88] sm:$0xff] %v440_v23  ;;  %423 = vst [vmem:[%s675_s3 + $0x98] sm:$0xff] %v440_v23  ;;  %v30_v25 = vld [vmem:[%s676_s0] sm:$0xff] }
   0x7   :  { %424 = vst [vmem:[%s675_s3 + $0xa8] sm:$0xff] %v440_v23  ;;  %425 = vst [vmem:[%s675_s3 + $0xb8] sm:$0xff] %v440_v23  ;;  %v32_v24 = vld [vmem:[%s676_s0 + $0x10] sm:$0xff]  ;;  %v557_v26 = vld [vmem:[%s677_s2] ss:$0 sm:$0xff] }
   0x8   :  { %426 = vst [vmem:[%s675_s3 + $0xc8] sm:$0xff] %v440_v23  ;;  %427 = vst [vmem:[%s675_s3 + $0xd8] sm:$0xff] %v440_v23  ;;  %v33_v31 = vld [vmem:[%s676_s0 + $0x18] sm:$0xff]  ;;  %v31_v32 = vld [vmem:[%s676_s0 + $0x8] sm:$0xff] }
   0x9   :  { %428 = vst [vmem:[%s675_s3 + $0xe8] sm:$0xff] %v440_v23  ;;  %429 = vst [vmem:[%s675_s3 + $0xf8] sm:$0xff] %v440_v23  ;;  %v35_v39 = vld [vmem:[%s676_s0 + $0x28] sm:$0xff]  ;;  %v34_v40 = vld [vmem:[%s676_s0 + $0x20] sm:$0xff] }
   0xa   :  { %73 = vperm.xlu1 %438, %v19_v5   ;;  %68 = vperm.xlu0 %437, %v18_v6   ;;  %v37_v47 = vld [vmem:[%s676_s0 + $0x38] sm:$0xff]  ;;  %v36_v48 = vld [vmem:[%s676_s0 + $0x30] sm:$0xff]  ;;  %v39_v55 = vld [vmem:[%s676_s0 + $0x48] sm:$0xff] }
   0xb   :  { %v38_v56 = vld [vmem:[%s676_s0 + $0x40] sm:$0xff]  ;;  %v41_v63 = vld [vmem:[%s676_s0 + $0x58] sm:$0xff]  ;;  %v40_v0 = vld [vmem:[%s676_s0 + $0x50] sm:$0xff] }
   0xe   :  { %83 = vperm.xlu1 %438, %v21_v7   ;;  %78 = vperm.xlu0 %437, %v20_v8   ;;  %v43_v8 = vld [vmem:[%s676_s0 + $0x68] sm:$0xff] }
  0x12   :  { %93 = vperm.xlu1 %438, %v23_v9   ;;  %88 = vperm.xlu0 %437, %v22_v10   ;;  %v42_v9 = vld [vmem:[%s676_s0 + $0x60] sm:$0xff]  ;;  %v198_v10 = vshrl.u32 %v197_v1, 7 }
  0x14   :  { %v199_v19 = vadd.s32 8, %v198_v10 }
  0x16   :  { %103 = vperm.xlu1 %438, %v25_v11   ;;  %98 = vperm.xlu0 %437, %v24_v12  }
  0x1a   :  { %113 = vperm.xlu1 %438, %v27_v13   ;;  %108 = vperm.xlu0 %437, %v26_v14  }
  0x1e   :  { %123 = vperm.xlu1 %438, %v29_v17   ;;  %118 = vperm.xlu0 %437, %v28_v18   ;;  %v45_v17 = vld [vmem:[%s676_s0 + $0x78] sm:$0xff]  ;;  %v44_v18 = vld [vmem:[%s676_s0 + $0x70] sm:$0xff] }
  0x22   :  { %321 = vperm.xlu1 %438, %v299_v21   ;;  %316 = vperm.xlu0 %437, %v298_v20   ;;  %v215_v20 = vand.u32 127, %v197_v1 }
  0x24   :  { %vm251_vm0 = vcmp.eq.s32.totalorder %v199_v19, %v215_v20  ;;  %vm250_vm1 = vcmp.eq.s32.totalorder %v198_v10, %v215_v20 }
  0x26   :  { %326 = vperm.xlu0 %437, %v300_v22  }
  0x81   :  { %v59_v27 = vpop.permute.xlu1 %58  ;;  %v49_v28 = vpop.permute.xlu0 %48 }
  0x82   :  { %v128_v29 = vmul.f32 %v59_v27, %v32_v24  ;;  %v126_v30 = vmul.f32 %v49_v28, %v30_v25  ;;  %v200_v28 = vadd.s32 16, %v198_v10 }
  0x84   :  { %v151_v33 = vmul.f32 %v557_v26, %v128_v29  ;;  %v149_v34 = vmul.f32 %v557_v26, %v126_v30  ;;  %vm252_vm2 = vcmp.eq.s32.totalorder %v200_v28, %v215_v20 }
  0x85   :  { %v64_v35 = vpop.permute.xlu1 %63  ;;  %v54_v36 = vpop.permute.xlu0 %53 }
  0x86   :  { %167 = vst [vmem:[%s675_s3 + $0x20] sm:$0xff] %v151_v33  ;;  %165 = vst [vmem:[%s675_s3] sm:$0xff] %v149_v34  ;;  %v129_v37 = vmul.f32 %v64_v35, %v33_v31  ;;  %v127_v38 = vmul.f32 %v54_v36, %v31_v32 }
  0x88   :  { %v152_v41 = vmul.f32 %v557_v26, %v129_v37  ;;  %v150_v42 = vmul.f32 %v557_v26, %v127_v38 }
  0x89   :  { %v74_v43 = vpop.permute.xlu1 %73  ;;  %v69_v44 = vpop.permute.xlu0 %68 }
  0x8a   :  { %168 = vst [vmem:[%s675_s3 + $0x30] sm:$0xff] %v152_v41  ;;  %166 = vst [vmem:[%s675_s3 + $0x10] sm:$0xff] %v150_v42  ;;  %v131_v45 = vmul.f32 %v74_v43, %v35_v39  ;;  %v130_v46 = vmul.f32 %v69_v44, %v34_v40 }
  0x8c   :  { %v154_v49 = vmul.f32 %v557_v26, %v131_v45  ;;  %v153_v50 = vmul.f32 %v557_v26, %v130_v46 }
  0x8d   :  { %v84_v51 = vpop.permute.xlu1 %83  ;;  %v79_v52 = vpop.permute.xlu0 %78 }
  0x8e   :  { %170 = vst [vmem:[%s675_s3 + $0x50] sm:$0xff] %v154_v49  ;;  %169 = vst [vmem:[%s675_s3 + $0x40] sm:$0xff] %v153_v50  ;;  %v133_v53 = vmul.f32 %v84_v51, %v37_v47  ;;  %v132_v54 = vmul.f32 %v79_v52, %v36_v48 }
  0x90   :  { %v156_v57 = vmul.f32 %v557_v26, %v133_v53  ;;  %v155_v58 = vmul.f32 %v557_v26, %v132_v54 }
  0x91   :  { %v94_v59 = vpop.permute.xlu1 %93  ;;  %v89_v60 = vpop.permute.xlu0 %88 }
  0x92   :  { %172 = vst [vmem:[%s675_s3 + $0x70] sm:$0xff] %v156_v57  ;;  %171 = vst [vmem:[%s675_s3 + $0x60] sm:$0xff] %v155_v58  ;;  %v135_v61 = vmul.f32 %v94_v59, %v39_v55  ;;  %v134_v62 = vmul.f32 %v89_v60, %v38_v56 }
  0x94   :  { %v158_v2 = vmul.f32 %v557_v26, %v135_v61  ;;  %v157_v3 = vmul.f32 %v557_v26, %v134_v62 }
  0x95   :  { %v104_v4 = vpop.permute.xlu1 %103  ;;  %v99_v5 = vpop.permute.xlu0 %98 }
  0x96   :  { %174 = vst [vmem:[%s675_s3 + $0x90] sm:$0xff] %v158_v2  ;;  %173 = vst [vmem:[%s675_s3 + $0x80] sm:$0xff] %v157_v3  ;;  %v137_v6 = vmul.f32 %v104_v4, %v41_v63  ;;  %v136_v7 = vmul.f32 %v99_v5, %v40_v0 }
  0x98   :  { %v160_v11 = vmul.f32 %v557_v26, %v137_v6  ;;  %v159_v12 = vmul.f32 %v557_v26, %v136_v7 }
  0x99   :  { %v114_v13 = vpop.permute.xlu1 %113  ;;  %v109_v14 = vpop.permute.xlu0 %108 }
  0x9a   :  { %176 = vst [vmem:[%s675_s3 + $0xb0] sm:$0xff] %v160_v11  ;;  %175 = vst [vmem:[%s675_s3 + $0xa0] sm:$0xff] %v159_v12  ;;  %v139_v15 = vmul.f32 %v114_v13, %v43_v8  ;;  %v138_v16 = vmul.f32 %v109_v14, %v42_v9 }
  0x9c   :  { %v162_v21 = vmul.f32 %v557_v26, %v139_v15  ;;  %v161_v22 = vmul.f32 %v557_v26, %v138_v16 }
  0x9d   :  { %v124_v23 = vpop.permute.xlu1 %123  ;;  %v119_v24 = vpop.permute.xlu0 %118 }
  0x9e   :  { %178 = vst [vmem:[%s675_s3 + $0xd0] sm:$0xff] %v162_v21  ;;  %177 = vst [vmem:[%s675_s3 + $0xc0] sm:$0xff] %v161_v22  ;;  %v141_v25 = vmul.f32 %v124_v23, %v45_v17  ;;  %v140_v27 = vmul.f32 %v119_v24, %v44_v18 }
  0xa0   :  { %v164_v29 = vmul.f32 %v557_v26, %v141_v25  ;;  %v163_v30 = vmul.f32 %v557_v26, %v140_v27 }
  0xa1   :  { %v322_v31 = vpop.permute.xlu1 %321  ;;  %v317_v32 = vpop.permute.xlu0 %316 }
  0xa2   :  { %180 = vst [vmem:[%s675_s3 + $0xf0] sm:$0xff] %v164_v29  ;;  %179 = vst [vmem:[%s675_s3 + $0xe0] sm:$0xff] %v163_v30  ;;  %v395_v33 = vsel %vm251_vm0, %v322_v31, 0.0  ;;  %v394_v34 = vsel %vm250_vm1, %v317_v32, 0.0 }
  0xa3   :  { %415 = vst [vmem:[%s675_s3 + $0x18] sm:$0xff] %v395_v33  ;;  %414 = vst [vmem:[%s675_s3 + $0x8] sm:$0xff] %v394_v34 }
  0xa5   :  { %v327_v26 = vpop.permute.xlu0 %326 }
  0xa6   :  { %v396_v35 = vsel %vm252_vm2, %v327_v26, 0.0 }
  0xa7   :  { %416 = vst [vmem:[%s675_s3 + $0x28] sm:$0xff] %v396_v35 }

</bundles_post_ra>
